<compile_context>
chip_gen: v7x
topology: tpu7x:2x2x1
jax: 0.10.0
libtpu: 0.0.40
codegen_flags: <defaults>
</compile_context>

<pallas_src>
import jax
import jax.numpy as jnp
from jax.experimental import pallas as pl
from jax.experimental.pallas import tpu as pltpu

# KarateClub: 34 nodes, 34 node features.
NUM_NODES = 34
NUM_FEATURES = 34
HIDDEN = 4
OUT = 4


def _round_up(v, m):
    return -(-v // m) * m


def _tensorcores_per_chip():
    """Best-effort TC-per-chip count (v7x has 2; v5e/v6e have 1)."""
    try:
        d = jax.devices()[0]
        if d.platform != "tpu":
            return 1
        return 2 if "v7" in d.device_kind.lower() else 1
    except Exception:  # pragma: no cover - defensive fallback
        return 1


def _pick_num_blocks(rows):
    nb = _tensorcores_per_chip()
    # Each block's row count must stay a multiple of 8 (sublane grain).
    if nb > 1 and rows % (nb * 8) == 0:
        return nb
    return 1


def mlp_kernel(x_ref, w1_ref, b1_ref, w2_ref, b2_ref, o_ref):
    # ---- layer 1 on the MXU: [rows, F] @ [F, 128] (K=34 masked by Mosaic) ----
    h = jnp.dot(x_ref[...], w1_ref[...], preferred_element_type=jnp.float32)
    h = jnp.maximum(h + b1_ref[...], 0.0)            # bias + relu
    # dropout(p=0.5, training=False) -> identity (eval mode).
    # ---- layer 2 on the MXU: h is lane-dense [rows, 128]; w2 padded to [128, 4] ----
    y = jnp.dot(h, w2_ref[...], preferred_element_type=jnp.float32) + b2_ref[...]
    o_ref[...] = y.astype(o_ref.dtype)


def prepare_params(w1, b1, w2, b2):
    """One-time padding of the static weights to the (8,128) grain.

    w1: [F, H] -> [F, H_PAD=128]   (lane-dense layer-1 output)
    b1: [., H] -> [1, H_PAD]
    w2: [H, O] -> [H_PAD, O]       (rows padded with zeros; output stays O=4)
    b2: [., O] -> [1, O]
    """
    f, h = w1.shape
    h2, out = w2.shape
    assert h == h2
    h_pad = _round_up(h, 128)
    w1_p = jnp.pad(w1, ((0, 0), (0, h_pad - h)))
    b1_p = jnp.pad(b1.reshape(1, h), ((0, 0), (0, h_pad - h)))
    w2_p = jnp.pad(w2, ((0, h_pad - h), (0, 0)))
    b2_p = b2.reshape(1, out)
    return w1_p, b1_p, w2_p, b2_p


def mlp_forward(x, w1_p, b1_p, w2_p, b2_p, *, num_blocks=None):
    """Forward pass.  x: [N, F] or [B, N, F]; params pre-padded by prepare_params."""
    squeeze = x.ndim == 2
    xb = x[None] if squeeze else x
    bsz, n, f = xb.shape
    h_pad = w1_p.shape[1]
    out = w2_p.shape[1]

    # Fold batch into the sublane/row dimension (free, contiguous reshape).
    rows = bsz * n
    x2 = xb.reshape(rows, f)

    if num_blocks is None:
        num_blocks = _pick_num_blocks(rows)
    rows_blk = rows // num_blocks

    cost = pl.CostEstimate(
        flops=2 * rows * (f * h_pad + h_pad * out),
        transcendentals=0,
        bytes_accessed=4 * (rows * f + w1_p.size + b1_p.size
                            + w2_p.size + b2_p.size + rows * out),
    )

    out2 = pl.pallas_call(
        mlp_kernel,
        out_shape=jax.ShapeDtypeStruct((rows, out), jnp.float32),
        grid=(num_blocks,),
        in_specs=[
            pl.BlockSpec((rows_blk, f), lambda i: (i, 0)),
            pl.BlockSpec(w1_p.shape, lambda i: (0, 0)),
            pl.BlockSpec(b1_p.shape, lambda i: (0, 0)),
            pl.BlockSpec(w2_p.shape, lambda i: (0, 0)),
            pl.BlockSpec(b2_p.shape, lambda i: (0, 0)),
        ],
        out_specs=pl.BlockSpec((rows_blk, out), lambda i: (i, 0)),
        compiler_params=pltpu.CompilerParams(
            dimension_semantics=("parallel",)),
        cost_estimate=cost,
    )(x2, w1_p, b1_p, w2_p, b2_p)

    out_arr = out2.reshape(bsz, n, out)          # free, contiguous reshape
    return out_arr[0] if squeeze else out_arr


def init_params(key):
    # Deterministic init mimicking nn.Linear's U(-1/sqrt(fan_in), 1/sqrt(fan_in)).
    k1, k2, k3, k4 = jax.random.split(key, 4)
    bound1 = 1.0 / jnp.sqrt(jnp.float32(NUM_FEATURES))
    bound2 = 1.0 / jnp.sqrt(jnp.float32(HIDDEN))
    w1 = jax.random.uniform(k1, (NUM_FEATURES, HIDDEN), jnp.float32,
                            -bound1, bound1)
    b1 = jax.random.uniform(k2, (1, HIDDEN), jnp.float32, -bound1, bound1)
    w2 = jax.random.uniform(k3, (HIDDEN, OUT), jnp.float32, -bound2, bound2)
    b2 = jax.random.uniform(k4, (1, OUT), jnp.float32, -bound2, bound2)
    return w1, b1, w2, b2


if __name__ == "__main__":
    key = jax.random.PRNGKey(0)
    k_x, k_p = jax.random.split(key)
    w1, b1, w2, b2 = init_params(k_p)
    params = prepare_params(w1, b1, w2, b2)   # pad ONCE, outside the hot path

    # Batched run: 8 independent KarateClub-sized feature matrices in one call
    # (folded to 272 rows -> one MXU pass per layer; grid=(2,) only on v7x).
    BATCH = 8
    xb = jax.random.normal(k_x, (BATCH, NUM_NODES, NUM_FEATURES), jnp.float32)
    out_b = mlp_forward(xb, *params)
    jax.block_until_ready(out_b)

    # Single-graph run (original module semantics: x is [34, 34]).
    x = xb[0]
    out_s = mlp_forward(x, *params)
    jax.block_until_ready(out_s)

    # Pure-JAX reference.
    ref_b = jnp.maximum(xb @ w1 + b1, 0.0) @ w2 + b2
    assert out_b.shape == (BATCH, NUM_NODES, OUT)
    assert out_s.shape == (NUM_NODES, OUT)
    assert jnp.allclose(out_b, ref_b, atol=1e-5, rtol=1e-5)
    assert jnp.allclose(out_s, ref_b[0], atol=1e-5, rtol=1e-5)

    print("KERNEL_OK")
</pallas_src>

<mosaic_0001>
module attributes {stable_mosaic.version = 11 : i64} {
  func.func @mlp_kernel(%arg0: i32, %arg1: memref<272x34xf32, #tpu.memory_space<vmem>>, %arg2: memref<34x128xf32, #tpu.memory_space<vmem>>, %arg3: memref<1x128xf32, #tpu.memory_space<vmem>>, %arg4: memref<128x4xf32, #tpu.memory_space<vmem>>, %arg5: memref<1x4xf32, #tpu.memory_space<vmem>>, %arg6: memref<272x4xf32, #tpu.memory_space<vmem>>) attributes {dimension_semantics = [#tpu.dimension_semantics<parallel>], iteration_bounds = array<i64: 1>, scalar_prefetch = 0 : i64, scratch_operands = 0 : i64, tpu.core_type = #tpu.core_type<tc>, window_params = [{transform_indices = @transform_0, window_bounds = array<i64: 272, 34>}, {pipeline_mode = #tpu.pipeline_mode<synchronous>, transform_indices = @transform_1, window_bounds = array<i64: 34, 128>}, {pipeline_mode = #tpu.pipeline_mode<synchronous>, transform_indices = @transform_2, window_bounds = array<i64: 1, 128>}, {pipeline_mode = #tpu.pipeline_mode<synchronous>, transform_indices = @transform_3, window_bounds = array<i64: 128, 4>}, {pipeline_mode = #tpu.pipeline_mode<synchronous>, transform_indices = @transform_4, window_bounds = array<i64: 1, 4>}, {transform_indices = @transform_5, window_bounds = array<i64: 272, 4>}]} {
    %c0 = arith.constant 0 : index
    %c0_0 = arith.constant 0 : index
    %0 = vector.load %arg1[%c0, %c0_0] : memref<272x34xf32, #tpu.memory_space<vmem>>, vector<272x34xf32>
    %c0_1 = arith.constant 0 : index
    %c0_2 = arith.constant 0 : index
    %1 = vector.load %arg2[%c0_1, %c0_2] : memref<34x128xf32, #tpu.memory_space<vmem>>, vector<34x128xf32>
    %cst = arith.constant dense<0.000000e+00> : vector<272x128xf32>
    %2 = tpu.matmul %0, %1, %cst {dimension_numbers = #tpu.dot_dimension_numbers<[1], [0], [0], [1], [0, 0, 1, 1], [], []>} : vector<272x34xf32>, vector<34x128xf32>, vector<272x128xf32> -> vector<272x128xf32>
    %c0_3 = arith.constant 0 : index
    %c0_4 = arith.constant 0 : index
    %3 = vector.load %arg3[%c0_3, %c0_4] : memref<1x128xf32, #tpu.memory_space<vmem>>, vector<1x128xf32>
    %4 = vector.broadcast %3 : vector<1x128xf32> to vector<272x128xf32>
    %5 = arith.addf %2, %4 : vector<272x128xf32>
    %cst_5 = arith.constant 0.000000e+00 : f32
    %6 = vector.broadcast %cst_5 : f32 to vector<272x128xf32>
    %7 = arith.maximumf %5, %6 : vector<272x128xf32>
    %c0_6 = arith.constant 0 : index
    %c0_7 = arith.constant 0 : index
    %8 = vector.load %arg4[%c0_6, %c0_7] : memref<128x4xf32, #tpu.memory_space<vmem>>, vector<128x4xf32>
    %cst_8 = arith.constant dense<0.000000e+00> : vector<272x4xf32>
    %9 = tpu.matmul %7, %8, %cst_8 {dimension_numbers = #tpu.dot_dimension_numbers<[1], [0], [0], [1], [0, 0, 1, 1], [], []>} : vector<272x128xf32>, vector<128x4xf32>, vector<272x4xf32> -> vector<272x4xf32>
    %c0_9 = arith.constant 0 : index
    %c0_10 = arith.constant 0 : index
    %10 = vector.load %arg5[%c0_9, %c0_10] : memref<1x4xf32, #tpu.memory_space<vmem>>, vector<1x4xf32>
    %11 = vector.broadcast %10 : vector<1x4xf32> to vector<272x4xf32>
    %12 = arith.addf %9, %11 : vector<272x4xf32>
    %c0_11 = arith.constant 0 : index
    %c0_12 = arith.constant 0 : index
    %13 = vector.load %arg6[%c0_11, %c0_12] : memref<272x4xf32, #tpu.memory_space<vmem>>, vector<272x4xf32>
    tpu.vector_store %arg6[%c0_11, %c0_12], %12 {strides = array<i32>} : memref<272x4xf32, #tpu.memory_space<vmem>>, vector<272x4xf32>,
    return
  }
  func.func @transform_0(%arg0: i32) -> (i32, i32) {
    %c0_i32 = arith.constant 0 : i32
    %c0_i32_0 = arith.constant 0 : i32
    return %arg0, %c0_i32 : i32, i32
  }
  func.func @transform_1(%arg0: i32) -> (i32, i32) {
    %c0_i32 = arith.constant 0 : i32
    %c0_i32_0 = arith.constant 0 : i32
    %c0_i32_1 = arith.constant 0 : i32
    return %c0_i32, %c0_i32_0 : i32, i32
  }
  func.func @transform_2(%arg0: i32) -> (i32, i32) {
    %c0_i32 = arith.constant 0 : i32
    %c0_i32_0 = arith.constant 0 : i32
    %c0_i32_1 = arith.constant 0 : i32
    return %c0_i32, %c0_i32_0 : i32, i32
  }
  func.func @transform_3(%arg0: i32) -> (i32, i32) {
    %c0_i32 = arith.constant 0 : i32
    %c0_i32_0 = arith.constant 0 : i32
    %c0_i32_1 = arith.constant 0 : i32
    return %c0_i32, %c0_i32_0 : i32, i32
  }
  func.func @transform_4(%arg0: i32) -> (i32, i32) {
    %c0_i32 = arith.constant 0 : i32
    %c0_i32_0 = arith.constant 0 : i32
    %c0_i32_1 = arith.constant 0 : i32
    return %c0_i32, %c0_i32_0 : i32, i32
  }
  func.func @transform_5(%arg0: i32) -> (i32, i32) {
    %c0_i32 = arith.constant 0 : i32
    %c0_i32_0 = arith.constant 0 : i32
    return %arg0, %c0_i32 : i32, i32
  }
}

</mosaic_0001>

<bundles_post_ra>
// kernel: tpu_custom_call.1
= control target key start
LH: loop header
LB: loop body
LE: loop exit
PB: predicated region body
PF: predicated region fallthrough
CT: control target
= control target key end

     0   :  { %vm66_vm0 = vcmask 277504   ;;  %vm169_vm1 = vcmask 1041408   ;;  %vm700_vm2 = vcmask 31744   ;;  %s1508_s1 = inlined_call_operand.vmem [shape: f32[34,128], index: 1, kind: input, shape index: {}]   ;;  %s1509_s0 = inlined_call_operand.vmem [shape: f32[272,34], index: 0, kind: input, shape index: {}]   ;;  %s1510_s3 = inlined_call_operand.vmem [shape: f32[128,4], index: 3, kind: input, shape index: {}]   ;;  %s1511_s2 = inlined_call_operand.vmem [shape: f32[1,128], index: 2, kind: input, shape index: {}]   ;;  %s1512_s4 = inlined_call_operand.vmem [shape: f32[1,4], index: 4, kind: input, shape index: {}]   ;;  %s1513_s5 = inlined_call_operand.vmem [shape: f32[272,4], index: 5, kind: output, shape index: {}]  }
   0x1   :  { %v54_v0 = vld [vmem:[%s1508_s1] sm:$0xff]  ;;  %v55_v1 = vld [vmem:[%s1508_s1 + $0x8] sm:$0xff]  ;;  %v56_v2 = vld [vmem:[%s1508_s1 + $0x10] sm:$0xff] }
   0x2   :  { %v1009_v3 = vpack.c.bf16 %v55_v1, %v54_v0  ;;  %v57_v4 = vld [vmem:[%s1508_s1 + $0x18] sm:$0xff]  ;;  %v20_v5 = vld [vmem:[%s1509_s0] sm:$0xff]  ;;  %v21_v8 = vld [vmem:[%s1509_s0 + $0x8] sm:$0xff] }
   0x3   :  { %v1013_v6 = vpack.c.bf16 %v57_v4, %v56_v2  ;;  %875 = vmatprep.mubr.msk.f32.mxu0 %vm66_vm0, %v20_v5  ;;  %v58_v7 = vld [vmem:[%s1508_s1 + $0x20] sm:$0x3]  ;;  %v22_v9 = vld [vmem:[%s1509_s0 + $0x10] sm:$0xff]  ;;  %v443_v11 = vld [vmem:[%s1510_s3 + $0x8] sm:$0xff] }
   0x4   :  { %1010 = vmatprep.subr.bf16.mxu0 %v1009_v3  ;;  %v442_v10 = vld [vmem:[%s1510_s3] sm:$0xff]  ;;  %v444_v12 = vld [vmem:[%s1510_s3 + $0x10] sm:$0xff]  ;;  %v23_v13 = vld [vmem:[%s1509_s0 + $0x18] sm:$0xff] }
   0x5   :  { %1012 = vmatpush3.bf16.msra.mxu0 %v1009_v3  ;;  %v1017_v14 = vpack.c.bf16 %v443_v11, %v442_v10  ;;  %v445_v15 = vld [vmem:[%s1510_s3 + $0x18] sm:$0xff]  ;;  %v24_v16 = vld [vmem:[%s1509_s0 + $0x20] sm:$0xff]  ;;  %v447_v19 = vld [vmem:[%s1510_s3 + $0x28] sm:$0xff] }
   0x6   :  { %1014 = vmatprep.subr.bf16.mxu0 %v1013_v6  ;;  %v1021_v17 = vpack.c.bf16 %v445_v15, %v444_v12  ;;  %v446_v18 = vld [vmem:[%s1510_s3 + $0x20] sm:$0xff]  ;;  %v25_v20 = vld [vmem:[%s1509_s0 + $0x28] sm:$0xff]  ;;  %v26_v21 = vld [vmem:[%s1509_s0 + $0x30] sm:$0xff] }
   0x7   :  { %1049 = vmatprep.subr.bf16.mxu1 %v1017_v14  ;;  %v1025_v22 = vpack.c.bf16 %v447_v19, %v446_v18  ;;  %v448_v23 = vld [vmem:[%s1510_s3 + $0x30] sm:$0xff]  ;;  %v449_v24 = vld [vmem:[%s1510_s3 + $0x38] sm:$0xff]  ;;  %v28_v26 = vld [vmem:[%s1509_s0 + $0x40] sm:$0xff] }
   0x8   :  { %1057 = vmatpush3.bf16.msra.mxu1 %v1017_v14  ;;  %v27_v25 = vld [vmem:[%s1509_s0 + $0x38] sm:$0xff]  ;;  %v1029_v27 = vpack.c.bf16 %v449_v24, %v448_v23  ;;  %v450_v28 = vld [vmem:[%s1510_s3 + $0x40] sm:$0xff]  ;;  %v451_v29 = vld [vmem:[%s1510_s3 + $0x48] sm:$0xff] }
   0x9   :  { %1016 = vmatpush3.bf16.msra.mxu0 %v1013_v6  ;;  %1050 = vmatprep.subr.bf16.mxu1 %v1021_v17  ;;  %v29_v30 = vld [vmem:[%s1509_s0 + $0x48] sm:$0xff]  ;;  %v30_v31 = vld [vmem:[%s1509_s0 + $0x50] sm:$0xff]  ;;  %v1033_v32 = vpack.c.bf16 %v451_v29, %v450_v28  ;;  %v453_v34 = vld [vmem:[%s1510_s3 + $0x58] sm:$0xff] }
   0xa   :  { %873 = vmatprep.subr.msk.mxu0 %vm169_vm1, %v58_v7  ;;  %v452_v33 = vld [vmem:[%s1510_s3 + $0x50] sm:$0xff]  ;;  %v31_v35 = vld [vmem:[%s1509_s0 + $0x58] sm:$0xff]  ;;  %v32_v36 = vld [vmem:[%s1509_s0 + $0x60] sm:$0xff] }
   0xb   :  { %v1037_v37 = vpack.c.bf16 %v453_v34, %v452_v33  ;;  %v454_v38 = vld [vmem:[%s1510_s3 + $0x60] sm:$0xff]  ;;  %v455_v39 = vld [vmem:[%s1510_s3 + $0x68] sm:$0xff]  ;;  %v34_v41 = vld [vmem:[%s1509_s0 + $0x70] sm:$0xff] }
   0xc   :  { %1058 = vmatpush3.bf16.msra.mxu1 %v1021_v17  ;;  %v33_v40 = vld [vmem:[%s1509_s0 + $0x68] sm:$0xff]  ;;  %v1041_v42 = vpack.c.bf16 %v455_v39, %v454_v38  ;;  %v35_v43 = vld [vmem:[%s1509_s0 + $0x78] sm:$0xff]  ;;  %v36_v44 = vld [vmem:[%s1509_s0 + $0x80] sm:$0xff] }
   0xd   :  { %874 = vmatpush3.msk.msra.mxu0 %vm169_vm1, %v58_v7  ;;  %1051 = vmatprep.subr.bf16.mxu1 %v1025_v22  ;;  %v37_v45 = vld [vmem:[%s1509_s0 + $0x88] sm:$0xff]  ;;  %v38_v46 = vld [vmem:[%s1509_s0 + $0x90] sm:$0xff]  ;;  %v39_v47 = vld [vmem:[%s1509_s0 + $0x98] sm:$0xff] }
   0xe   :  { %876 = vmatmul.mubr.msk.f32.vlgmr.msra.gmra.mrb[0].mxu0 %vm66_vm0, %v21_v8  ;;  %1018 = vmatprep.subr.bf16.mxu0 %v1017_v14  ;;  %v40_v48 = vld [vmem:[%s1509_s0 + $0xa0] sm:$0xff]  ;;  %v41_v49 = vld [vmem:[%s1509_s0 + $0xa8] sm:$0xff]  ;;  %v42_v50 = vld [vmem:[%s1509_s0 + $0xb0] sm:$0xff] }
   0xf   :  { %878 = vmatprep.mubr.msk.f32.mxu0 %vm66_vm0, %v22_v9  ;;  %1020 = vmatpush3.bf16.msra.mxu0 %v1017_v14  ;;  %v43_v51 = vld [vmem:[%s1509_s0 + $0xb8] sm:$0xff]  ;;  %v44_v52 = vld [vmem:[%s1509_s0 + $0xc0] sm:$0xff]  ;;  %v45_v53 = vld [vmem:[%s1509_s0 + $0xc8] sm:$0xff] }
  0x10   :  { %1022 = vmatprep.subr.bf16.mxu0 %v1021_v17  ;;  %1059 = vmatpush3.bf16.msra.mxu1 %v1025_v22  ;;  %v46_v54 = vld [vmem:[%s1509_s0 + $0xd0] sm:$0xff]  ;;  %v47_v55 = vld [vmem:[%s1509_s0 + $0xd8] sm:$0xff]  ;;  %v48_v56 = vld [vmem:[%s1509_s0 + $0xe0] sm:$0xff] }
  0x11   :  { %1052 = vmatprep.subr.bf16.mxu1 %v1029_v27  ;;  %v49_v57 = vld [vmem:[%s1509_s0 + $0xe8] sm:$0xff]  ;;  %v50_v58 = vld [vmem:[%s1509_s0 + $0xf0] sm:$0xff]  ;;  %v51_v59 = vld [vmem:[%s1509_s0 + $0xf8] sm:$0xff] }
  0x12   :  { %879 = vmatmul.mubr.msk.f32.gmra.mrb[2].mxu0 %vm66_vm0, %v23_v13  ;;  %v52_v60 = vld [vmem:[%s1509_s0 + $0x100] sm:$0xff]  ;;  %v53_v61 = vld [vmem:[%s1509_s0 + $0x108] sm:$0xff]  ;;  %v456_v62 = vld [vmem:[%s1510_s3 + $0x70] sm:$0xff] }
  0x13   :  { %881 = vmatprep.mubr.msk.f32.mxu0 %vm66_vm0, %v24_v16  ;;  %1024 = vmatpush3.bf16.msra.mxu0 %v1021_v17  ;;  %v457_v63 = vld [vmem:[%s1510_s3 + $0x78] sm:$0xff]  ;;  %v1297_v1 = vld [vmem:[%s1511_s2] ss:$0 sm:$0xff] }
  0x14   :  { %1026 = vmatprep.subr.bf16.mxu0 %v1025_v22  ;;  %1060 = vmatpush3.bf16.msra.mxu1 %v1029_v27  ;;  %v1045_v0 = vpack.c.bf16 %v457_v63, %v456_v62 }
  0x15   :  { %1053 = vmatprep.subr.bf16.mxu1 %v1033_v32 }
  0x16   :  { %882 = vmatmul.mubr.msk.f32.gmra.mrb[4].mxu0 %vm66_vm0, %v25_v20 }
  0x17   :  { %884 = vmatprep.mubr.msk.f32.mxu0 %vm66_vm0, %v26_v21  ;;  %1028 = vmatpush3.bf16.msra.mxu0 %v1025_v22 }
  0x18   :  { %1030 = vmatprep.subr.bf16.mxu0 %v1029_v27  ;;  %1061 = vmatpush3.bf16.msra.mxu1 %v1033_v32 }
  0x19   :  { %1054 = vmatprep.subr.bf16.mxu1 %v1037_v37 }
  0x1a   :  { %885 = vmatmul.mubr.msk.f32.gmra.mrb[6].mxu0 %vm66_vm0, %v27_v25 }
  0x1b   :  { %887 = vmatprep.mubr.msk.f32.mxu0 %vm66_vm0, %v28_v26  ;;  %1032 = vmatpush3.bf16.msra.mxu0 %v1029_v27 }
  0x1c   :  { %1034 = vmatprep.subr.bf16.mxu0 %v1033_v32  ;;  %1062 = vmatpush3.bf16.msra.mxu1 %v1037_v37 }
  0x1d   :  { %1055 = vmatprep.subr.bf16.mxu1 %v1041_v42 }
  0x1e   :  { %888 = vmatmul.mubr.msk.f32.gmra.mrb[8].mxu0 %vm66_vm0, %v29_v30 }
  0x1f   :  { %890 = vmatprep.mubr.msk.f32.mxu0 %vm66_vm0, %v30_v31  ;;  %1036 = vmatpush3.bf16.msra.mxu0 %v1033_v32 }
  0x20   :  { %1038 = vmatprep.subr.bf16.mxu0 %v1037_v37  ;;  %1063 = vmatpush3.bf16.msra.mxu1 %v1041_v42 }
  0x21   :  { %1056 = vmatprep.subr.bf16.mxu1 %v1045_v0 }
  0x22   :  { %891 = vmatmul.mubr.msk.f32.gmra.mrb[10].mxu0 %vm66_vm0, %v31_v35 }
  0x23   :  { %893 = vmatprep.mubr.msk.f32.mxu0 %vm66_vm0, %v32_v36  ;;  %1040 = vmatpush3.bf16.msra.mxu0 %v1037_v37 }
  0x24   :  { %1042 = vmatprep.subr.bf16.mxu0 %v1041_v42  ;;  %1064 = vmatpush3.bf16.msra.mxu1 %v1045_v0 }
  0x26   :  { %894 = vmatmul.mubr.msk.f32.gmra.mrb[12].mxu0 %vm66_vm0, %v33_v40 }
  0x27   :  { %896 = vmatprep.mubr.msk.f32.mxu0 %vm66_vm0, %v34_v41  ;;  %1044 = vmatpush3.bf16.msra.mxu0 %v1041_v42 }
  0x28   :  { %1046 = vmatprep.subr.bf16.mxu0 %v1045_v0 }
  0x2a   :  { %897 = vmatmul.mubr.msk.f32.gmra.mrb[14].mxu0 %vm66_vm0, %v35_v43 }
  0x2b   :  { %899 = vmatprep.mubr.msk.f32.mxu0 %vm66_vm0, %v36_v44  ;;  %1048 = vmatpush3.bf16.msra.mxu0 %v1045_v0 }
  0x2e   :  { %900 = vmatmul.mubr.msk.f32.gmra.mrb[16].mxu0 %vm66_vm0, %v37_v45 }
  0x2f   :  { %902 = vmatprep.mubr.msk.f32.mxu0 %vm66_vm0, %v38_v46 }
  0x32   :  { %903 = vmatmul.mubr.msk.f32.gmra.mrb[18].mxu0 %vm66_vm0, %v39_v47 }
  0x33   :  { %905 = vmatprep.mubr.msk.f32.mxu0 %vm66_vm0, %v40_v48 }
  0x36   :  { %906 = vmatmul.mubr.msk.f32.gmra.mrb[20].mxu0 %vm66_vm0, %v41_v49 }
  0x37   :  { %908 = vmatprep.mubr.msk.f32.mxu0 %vm66_vm0, %v42_v50 }
  0x3a   :  { %909 = vmatmul.mubr.msk.f32.gmra.mrb[22].mxu0 %vm66_vm0, %v43_v51 }
  0x3b   :  { %911 = vmatprep.mubr.msk.f32.mxu0 %vm66_vm0, %v44_v52 }
  0x3e   :  { %912 = vmatmul.mubr.msk.f32.gmra.mrb[24].mxu0 %vm66_vm0, %v45_v53 }
  0x3f   :  { %914 = vmatprep.mubr.msk.f32.mxu0 %vm66_vm0, %v46_v54 }
  0x42   :  { %915 = vmatmul.mubr.msk.f32.gmra.mrb[26].mxu0 %vm66_vm0, %v47_v55 }
  0x43   :  { %917 = vmatprep.mubr.msk.f32.mxu0 %vm66_vm0, %v48_v56 }
  0x46   :  { %918 = vmatmul.mubr.msk.f32.gmra.mrb[28].mxu0 %vm66_vm0, %v49_v57 }
  0x47   :  { %920 = vmatprep.mubr.msk.f32.mxu0 %vm66_vm0, %v50_v58 }
  0x4a   :  { %921 = vmatmul.mubr.msk.f32.gmra.mrb[30].mxu0 %vm66_vm0, %v51_v59 }
  0x4b   :  { %923 = vmatprep.mubr.msk.f32.mxu0 %vm66_vm0, %v52_v60 }
  0x4e   :  { %924 = vmatmul.mubr.msk.f32.gmra.mrb[32].mxu0 %vm66_vm0, %v53_v61 }
  0xe1   :  { %v877_v2 = vpop.f32.mrb[0].mxu0 }
  0xe2   :  { %v245_v3 = vadd.f32 %v877_v2, %v1297_v1  ;;  %v239_v4 = vpop.f32.mrb[1].mxu0 }
  0xe3   :  { %v240_v5 = vadd.f32 %v1297_v1, %v239_v4 }
  0xe4   :  { %v409_v8 = vmax.f32 %v245_v3, 0.0 }
  0xe5   :  { %v408_v6 = vmax.f32 %v240_v5, 0.0  ;;  %v880_v7 = vpop.f32.mrb[2].mxu0 }
  0xe6   :  { %v255_v9 = vadd.f32 %v880_v7, %v1297_v1  ;;  %v249_v10 = vpop.f32.mrb[3].mxu0 }
  0xe7   :  { %v250_v11 = vadd.f32 %v1297_v1, %v249_v10  ;;  %958 = vmatprep.mubr.f32.mxu0 %v408_v6 }
  0xe8   :  { %959 = vmatmul.mubr.f32.vlgmr.msra.gmra.mrb[34].mxu0 %v409_v8  ;;  %v411_v14 = vmax.f32 %v255_v9, 0.0 }
  0xe9   :  { %v410_v12 = vmax.f32 %v250_v11, 0.0  ;;  %v883_v13 = vpop.f32.mrb[4].mxu0 }
  0xea   :  { %v265_v15 = vadd.f32 %v883_v13, %v1297_v1  ;;  %v259_v16 = vpop.f32.mrb[5].mxu0 }
  0xeb   :  { %961 = vmatprep.mubr.f32.mxu0 %v410_v12  ;;  %v260_v17 = vadd.f32 %v1297_v1, %v259_v16 }
  0xec   :  { %962 = vmatmul.mubr.f32.gmra.mrb[36].mxu0 %v411_v14  ;;  %v413_v20 = vmax.f32 %v265_v15, 0.0 }
  0xed   :  { %v886_v18 = vpop.f32.mrb[6].mxu0  ;;  %v412_v19 = vmax.f32 %v260_v17, 0.0 }
  0xee   :  { %v275_v21 = vadd.f32 %v886_v18, %v1297_v1  ;;  %v269_v22 = vpop.f32.mrb[7].mxu0 }
  0xef   :  { %v270_v23 = vadd.f32 %v1297_v1, %v269_v22  ;;  %964 = vmatprep.mubr.f32.mxu1 %v412_v19 }
  0xf0   :  { %965 = vmatmul.mubr.f32.vlgmr.msra.gmra.mrb[0].mxu1 %v413_v20  ;;  %v415_v26 = vmax.f32 %v275_v21, 0.0 }
  0xf1   :  { %v414_v24 = vmax.f32 %v270_v23, 0.0  ;;  %v889_v25 = vpop.f32.mrb[8].mxu0 }
  0xf2   :  { %v285_v27 = vadd.f32 %v889_v25, %v1297_v1  ;;  %v279_v28 = vpop.f32.mrb[9].mxu0 }
  0xf3   :  { %v280_v29 = vadd.f32 %v1297_v1, %v279_v28  ;;  %967 = vmatprep.mubr.f32.mxu1 %v414_v24 }
  0xf4   :  { %968 = vmatmul.mubr.f32.gmra.mrb[2].mxu1 %v415_v26  ;;  %v417_v32 = vmax.f32 %v285_v27, 0.0 }
  0xf5   :  { %v416_v30 = vmax.f32 %v280_v29, 0.0  ;;  %v892_v31 = vpop.f32.mrb[10].mxu0 }
  0xf6   :  { %v295_v33 = vadd.f32 %v892_v31, %v1297_v1  ;;  %v289_v34 = vpop.f32.mrb[11].mxu0 }
  0xf7   :  { %v290_v35 = vadd.f32 %v1297_v1, %v289_v34  ;;  %970 = vmatprep.mubr.f32.mxu1 %v416_v30 }
  0xf8   :  { %971 = vmatmul.mubr.f32.gmra.mrb[4].mxu1 %v417_v32  ;;  %v419_v38 = vmax.f32 %v295_v33, 0.0 }
  0xf9   :  { %v418_v36 = vmax.f32 %v290_v35, 0.0  ;;  %v895_v37 = vpop.f32.mrb[12].mxu0 }
  0xfa   :  { %v305_v39 = vadd.f32 %v895_v37, %v1297_v1  ;;  %v299_v40 = vpop.f32.mrb[13].mxu0 }
  0xfb   :  { %v300_v41 = vadd.f32 %v1297_v1, %v299_v40  ;;  %973 = vmatprep.mubr.f32.mxu1 %v418_v36 }
  0xfc   :  { %974 = vmatmul.mubr.f32.gmra.mrb[6].mxu1 %v419_v38  ;;  %v421_v44 = vmax.f32 %v305_v39, 0.0 }
  0xfd   :  { %v420_v42 = vmax.f32 %v300_v41, 0.0  ;;  %v898_v43 = vpop.f32.mrb[14].mxu0  ;;  %v1336_v41 = vld [vmem:[%s1512_s4] ss:$0 sm:$0xff] }
  0xfe   :  { %v315_v45 = vadd.f32 %v898_v43, %v1297_v1  ;;  %v309_v46 = vpop.f32.mrb[15].mxu0 }
  0xff   :  { %v310_v47 = vadd.f32 %v1297_v1, %v309_v46  ;;  %976 = vmatprep.mubr.f32.mxu1 %v420_v42 }
 0x100   :  { %977 = vmatmul.mubr.f32.gmra.mrb[8].mxu1 %v421_v44  ;;  %v423_v50 = vmax.f32 %v315_v45, 0.0 }
 0x101   :  { %v422_v48 = vmax.f32 %v310_v47, 0.0  ;;  %v901_v49 = vpop.f32.mrb[16].mxu0 }
 0x102   :  { %v325_v51 = vadd.f32 %v901_v49, %v1297_v1  ;;  %v319_v52 = vpop.f32.mrb[17].mxu0 }
 0x103   :  { %v320_v53 = vadd.f32 %v1297_v1, %v319_v52  ;;  %979 = vmatprep.mubr.f32.mxu1 %v422_v48 }
 0x104   :  { %980 = vmatmul.mubr.f32.gmra.mrb[10].mxu1 %v423_v50  ;;  %v425_v56 = vmax.f32 %v325_v51, 0.0 }
 0x105   :  { %v424_v54 = vmax.f32 %v320_v53, 0.0  ;;  %v904_v55 = vpop.f32.mrb[18].mxu0 }
 0x106   :  { %v335_v57 = vadd.f32 %v904_v55, %v1297_v1  ;;  %v329_v58 = vpop.f32.mrb[19].mxu0 }
 0x107   :  { %v330_v59 = vadd.f32 %v1297_v1, %v329_v58  ;;  %982 = vmatprep.mubr.f32.mxu1 %v424_v54 }
 0x108   :  { %983 = vmatmul.mubr.f32.gmra.mrb[12].mxu1 %v425_v56  ;;  %v427_v62 = vmax.f32 %v335_v57, 0.0 }
 0x109   :  { %v426_v60 = vmax.f32 %v330_v59, 0.0  ;;  %v907_v61 = vpop.f32.mrb[20].mxu0 }
 0x10a   :  { %v345_v63 = vadd.f32 %v907_v61, %v1297_v1  ;;  %v339_v0 = vpop.f32.mrb[21].mxu0 }
 0x10b   :  { %v340_v2 = vadd.f32 %v1297_v1, %v339_v0  ;;  %985 = vmatprep.mubr.f32.mxu1 %v426_v60 }
 0x10c   :  { %986 = vmatmul.mubr.f32.gmra.mrb[14].mxu1 %v427_v62  ;;  %v429_v5 = vmax.f32 %v345_v63, 0.0 }
 0x10d   :  { %v428_v3 = vmax.f32 %v340_v2, 0.0  ;;  %v910_v4 = vpop.f32.mrb[22].mxu0 }
 0x10e   :  { %v355_v6 = vadd.f32 %v910_v4, %v1297_v1  ;;  %v349_v7 = vpop.f32.mrb[23].mxu0 }
 0x10f   :  { %v350_v8 = vadd.f32 %v1297_v1, %v349_v7  ;;  %988 = vmatprep.mubr.f32.mxu1 %v428_v3 }
 0x110   :  { %989 = vmatmul.mubr.f32.gmra.mrb[16].mxu1 %v429_v5  ;;  %v431_v11 = vmax.f32 %v355_v6, 0.0 }
 0x111   :  { %v430_v9 = vmax.f32 %v350_v8, 0.0  ;;  %v913_v10 = vpop.f32.mrb[24].mxu0 }
 0x112   :  { %v365_v12 = vadd.f32 %v913_v10, %v1297_v1  ;;  %v359_v13 = vpop.f32.mrb[25].mxu0 }
 0x113   :  { %v360_v14 = vadd.f32 %v1297_v1, %v359_v13  ;;  %991 = vmatprep.mubr.f32.mxu1 %v430_v9 }
 0x114   :  { %992 = vmatmul.mubr.f32.gmra.mrb[18].mxu1 %v431_v11  ;;  %v433_v17 = vmax.f32 %v365_v12, 0.0 }
 0x115   :  { %v432_v15 = vmax.f32 %v360_v14, 0.0  ;;  %v916_v16 = vpop.f32.mrb[26].mxu0 }
 0x116   :  { %v375_v18 = vadd.f32 %v916_v16, %v1297_v1  ;;  %v369_v19 = vpop.f32.mrb[27].mxu0 }
 0x117   :  { %v370_v20 = vadd.f32 %v1297_v1, %v369_v19  ;;  %994 = vmatprep.mubr.f32.mxu1 %v432_v15 }
 0x118   :  { %995 = vmatmul.mubr.f32.gmra.mrb[20].mxu1 %v433_v17  ;;  %v435_v23 = vmax.f32 %v375_v18, 0.0 }
 0x119   :  { %v434_v21 = vmax.f32 %v370_v20, 0.0  ;;  %v919_v22 = vpop.f32.mrb[28].mxu0 }
 0x11a   :  { %v385_v24 = vadd.f32 %v919_v22, %v1297_v1  ;;  %v379_v25 = vpop.f32.mrb[29].mxu0 }
 0x11b   :  { %v380_v26 = vadd.f32 %v1297_v1, %v379_v25  ;;  %997 = vmatprep.mubr.f32.mxu1 %v434_v21 }
 0x11c   :  { %998 = vmatmul.mubr.f32.gmra.mrb[22].mxu1 %v435_v23  ;;  %v437_v29 = vmax.f32 %v385_v24, 0.0 }
 0x11d   :  { %v436_v27 = vmax.f32 %v380_v26, 0.0  ;;  %v922_v28 = vpop.f32.mrb[30].mxu0 }
 0x11e   :  { %v395_v30 = vadd.f32 %v922_v28, %v1297_v1  ;;  %v389_v31 = vpop.f32.mrb[31].mxu0 }
 0x11f   :  { %v390_v32 = vadd.f32 %v1297_v1, %v389_v31  ;;  %1000 = vmatprep.mubr.f32.mxu1 %v436_v27 }
 0x120   :  { %1001 = vmatmul.mubr.f32.gmra.mrb[24].mxu1 %v437_v29  ;;  %v439_v35 = vmax.f32 %v395_v30, 0.0 }
 0x121   :  { %v438_v33 = vmax.f32 %v390_v32, 0.0  ;;  %v925_v34 = vpop.f32.mrb[32].mxu0 }
 0x122   :  { %v405_v36 = vadd.f32 %v925_v34, %v1297_v1  ;;  %v399_v37 = vpop.f32.mrb[33].mxu0 }
 0x123   :  { %v400_v38 = vadd.f32 %v1297_v1, %v399_v37  ;;  %1003 = vmatprep.mubr.f32.mxu1 %v438_v33 }
 0x124   :  { %1004 = vmatmul.mubr.f32.gmra.mrb[26].mxu1 %v439_v35  ;;  %v441_v40 = vmax.f32 %v405_v36, 0.0 }
 0x125   :  { %v440_v39 = vmax.f32 %v400_v38, 0.0 }
 0x127   :  { %1006 = vmatprep.mubr.f32.mxu1 %v440_v39 }
 0x128   :  { %1007 = vmatmul.mubr.f32.gmra.mrb[28].mxu1 %v441_v40 }
 0x1bb   :  { %v960_v42 = vpop.f32.mrb[34].mxu0 }
 0x1bc   :  { %v537_v43 = vadd.f32 %v960_v42, %v1336_v41  ;;  %v531_v44 = vpop.f32.mrb[35].mxu0 }
 0x1bd   :  { %v532_v45 = vadd.f32 %v1336_v41, %v531_v44 }
 0x1be   :  { %702 = vst.msk [vmem:[%s1513_s5 + $0x8] sm:$0xff] %vm700_vm2, %v537_v43 }
 0x1bf   :  { %701 = vst.msk [vmem:[%s1513_s5] sm:$0xff] %vm700_vm2, %v532_v45  ;;  %v963_v1 = vpop.f32.mrb[36].mxu0 }
 0x1c0   :  { %v547_v46 = vadd.f32 %v963_v1, %v1336_v41  ;;  %v541_v47 = vpop.f32.mrb[37].mxu0 }
 0x1c1   :  { %v542_v48 = vadd.f32 %v1336_v41, %v541_v47 }
 0x1c2   :  { %704 = vst.msk [vmem:[%s1513_s5 + $0x18] sm:$0xff] %vm700_vm2, %v547_v46 }
 0x1c3   :  { %703 = vst.msk [vmem:[%s1513_s5 + $0x10] sm:$0xff] %vm700_vm2, %v542_v48  ;;  %v966_v49 = vpop.f32.mrb[0].mxu1 }
 0x1c4   :  { %v557_v50 = vadd.f32 %v966_v49, %v1336_v41  ;;  %v551_v51 = vpop.f32.mrb[1].mxu1 }
 0x1c5   :  { %v552_v52 = vadd.f32 %v1336_v41, %v551_v51 }
 0x1c6   :  { %706 = vst.msk [vmem:[%s1513_s5 + $0x28] sm:$0xff] %vm700_vm2, %v557_v50 }
 0x1c7   :  { %705 = vst.msk [vmem:[%s1513_s5 + $0x20] sm:$0xff] %vm700_vm2, %v552_v52  ;;  %v969_v53 = vpop.f32.mrb[2].mxu1 }
 0x1c8   :  { %v567_v54 = vadd.f32 %v969_v53, %v1336_v41  ;;  %v561_v55 = vpop.f32.mrb[3].mxu1 }
 0x1c9   :  { %v562_v56 = vadd.f32 %v1336_v41, %v561_v55 }
 0x1ca   :  { %708 = vst.msk [vmem:[%s1513_s5 + $0x38] sm:$0xff] %vm700_vm2, %v567_v54 }
 0x1cb   :  { %707 = vst.msk [vmem:[%s1513_s5 + $0x30] sm:$0xff] %vm700_vm2, %v562_v56  ;;  %v972_v57 = vpop.f32.mrb[4].mxu1 }
 0x1cc   :  { %v577_v58 = vadd.f32 %v972_v57, %v1336_v41  ;;  %v571_v59 = vpop.f32.mrb[5].mxu1 }
 0x1cd   :  { %v572_v60 = vadd.f32 %v1336_v41, %v571_v59 }
 0x1ce   :  { %710 = vst.msk [vmem:[%s1513_s5 + $0x48] sm:$0xff] %vm700_vm2, %v577_v58 }
 0x1cf   :  { %709 = vst.msk [vmem:[%s1513_s5 + $0x40] sm:$0xff] %vm700_vm2, %v572_v60  ;;  %v975_v61 = vpop.f32.mrb[6].mxu1 }
 0x1d0   :  { %v587_v62 = vadd.f32 %v975_v61, %v1336_v41  ;;  %v581_v63 = vpop.f32.mrb[7].mxu1 }
 0x1d1   :  { %v582_v0 = vadd.f32 %v1336_v41, %v581_v63 }
 0x1d2   :  { %712 = vst.msk [vmem:[%s1513_s5 + $0x58] sm:$0xff] %vm700_vm2, %v587_v62 }
 0x1d3   :  { %711 = vst.msk [vmem:[%s1513_s5 + $0x50] sm:$0xff] %vm700_vm2, %v582_v0  ;;  %v978_v2 = vpop.f32.mrb[8].mxu1 }
 0x1d4   :  { %v597_v3 = vadd.f32 %v978_v2, %v1336_v41  ;;  %v591_v4 = vpop.f32.mrb[9].mxu1 }
 0x1d5   :  { %v592_v5 = vadd.f32 %v1336_v41, %v591_v4 }
 0x1d6   :  { %714 = vst.msk [vmem:[%s1513_s5 + $0x68] sm:$0xff] %vm700_vm2, %v597_v3 }
 0x1d7   :  { %713 = vst.msk [vmem:[%s1513_s5 + $0x60] sm:$0xff] %vm700_vm2, %v592_v5  ;;  %v981_v6 = vpop.f32.mrb[10].mxu1 }
 0x1d8   :  { %v607_v7 = vadd.f32 %v981_v6, %v1336_v41  ;;  %v601_v8 = vpop.f32.mrb[11].mxu1 }
 0x1d9   :  { %v602_v9 = vadd.f32 %v1336_v41, %v601_v8 }
 0x1da   :  { %716 = vst.msk [vmem:[%s1513_s5 + $0x78] sm:$0xff] %vm700_vm2, %v607_v7 }
 0x1db   :  { %715 = vst.msk [vmem:[%s1513_s5 + $0x70] sm:$0xff] %vm700_vm2, %v602_v9  ;;  %v984_v10 = vpop.f32.mrb[12].mxu1 }
 0x1dc   :  { %v617_v11 = vadd.f32 %v984_v10, %v1336_v41  ;;  %v611_v12 = vpop.f32.mrb[13].mxu1 }
 0x1dd   :  { %v612_v13 = vadd.f32 %v1336_v41, %v611_v12 }
 0x1de   :  { %718 = vst.msk [vmem:[%s1513_s5 + $0x88] sm:$0xff] %vm700_vm2, %v617_v11 }
 0x1df   :  { %717 = vst.msk [vmem:[%s1513_s5 + $0x80] sm:$0xff] %vm700_vm2, %v612_v13  ;;  %v987_v14 = vpop.f32.mrb[14].mxu1 }
 0x1e0   :  { %v627_v15 = vadd.f32 %v987_v14, %v1336_v41  ;;  %v621_v16 = vpop.f32.mrb[15].mxu1 }
 0x1e1   :  { %v622_v17 = vadd.f32 %v1336_v41, %v621_v16 }
 0x1e2   :  { %720 = vst.msk [vmem:[%s1513_s5 + $0x98] sm:$0xff] %vm700_vm2, %v627_v15 }
 0x1e3   :  { %719 = vst.msk [vmem:[%s1513_s5 + $0x90] sm:$0xff] %vm700_vm2, %v622_v17  ;;  %v990_v18 = vpop.f32.mrb[16].mxu1 }
 0x1e4   :  { %v637_v19 = vadd.f32 %v990_v18, %v1336_v41  ;;  %v631_v20 = vpop.f32.mrb[17].mxu1 }
 0x1e5   :  { %v632_v21 = vadd.f32 %v1336_v41, %v631_v20 }
 0x1e6   :  { %722 = vst.msk [vmem:[%s1513_s5 + $0xa8] sm:$0xff] %vm700_vm2, %v637_v19 }
 0x1e7   :  { %721 = vst.msk [vmem:[%s1513_s5 + $0xa0] sm:$0xff] %vm700_vm2, %v632_v21  ;;  %v993_v22 = vpop.f32.mrb[18].mxu1 }
 0x1e8   :  { %v647_v23 = vadd.f32 %v993_v22, %v1336_v41  ;;  %v641_v24 = vpop.f32.mrb[19].mxu1 }
 0x1e9   :  { %v642_v25 = vadd.f32 %v1336_v41, %v641_v24 }
 0x1ea   :  { %724 = vst.msk [vmem:[%s1513_s5 + $0xb8] sm:$0xff] %vm700_vm2, %v647_v23 }
 0x1eb   :  { %723 = vst.msk [vmem:[%s1513_s5 + $0xb0] sm:$0xff] %vm700_vm2, %v642_v25  ;;  %v996_v26 = vpop.f32.mrb[20].mxu1 }
 0x1ec   :  { %v657_v27 = vadd.f32 %v996_v26, %v1336_v41  ;;  %v651_v28 = vpop.f32.mrb[21].mxu1 }
 0x1ed   :  { %v652_v29 = vadd.f32 %v1336_v41, %v651_v28 }
 0x1ee   :  { %726 = vst.msk [vmem:[%s1513_s5 + $0xc8] sm:$0xff] %vm700_vm2, %v657_v27 }
 0x1ef   :  { %725 = vst.msk [vmem:[%s1513_s5 + $0xc0] sm:$0xff] %vm700_vm2, %v652_v29  ;;  %v999_v30 = vpop.f32.mrb[22].mxu1 }
 0x1f0   :  { %v667_v31 = vadd.f32 %v999_v30, %v1336_v41  ;;  %v661_v32 = vpop.f32.mrb[23].mxu1 }
 0x1f1   :  { %v662_v33 = vadd.f32 %v1336_v41, %v661_v32 }
 0x1f2   :  { %728 = vst.msk [vmem:[%s1513_s5 + $0xd8] sm:$0xff] %vm700_vm2, %v667_v31 }
 0x1f3   :  { %727 = vst.msk [vmem:[%s1513_s5 + $0xd0] sm:$0xff] %vm700_vm2, %v662_v33  ;;  %v1002_v34 = vpop.f32.mrb[24].mxu1 }
 0x1f4   :  { %v677_v35 = vadd.f32 %v1002_v34, %v1336_v41  ;;  %v671_v36 = vpop.f32.mrb[25].mxu1 }
 0x1f5   :  { %v672_v37 = vadd.f32 %v1336_v41, %v671_v36 }
 0x1f6   :  { %730 = vst.msk [vmem:[%s1513_s5 + $0xe8] sm:$0xff] %vm700_vm2, %v677_v35 }
 0x1f7   :  { %729 = vst.msk [vmem:[%s1513_s5 + $0xe0] sm:$0xff] %vm700_vm2, %v672_v37  ;;  %v1005_v38 = vpop.f32.mrb[26].mxu1 }
 0x1f8   :  { %v687_v39 = vadd.f32 %v1005_v38, %v1336_v41  ;;  %v681_v40 = vpop.f32.mrb[27].mxu1 }
 0x1f9   :  { %v682_v42 = vadd.f32 %v1336_v41, %v681_v40 }
 0x1fa   :  { %732 = vst.msk [vmem:[%s1513_s5 + $0xf8] sm:$0xff] %vm700_vm2, %v687_v39 }
 0x1fb   :  { %731 = vst.msk [vmem:[%s1513_s5 + $0xf0] sm:$0xff] %vm700_vm2, %v682_v42  ;;  %v1008_v43 = vpop.f32.mrb[28].mxu1 }
 0x1fc   :  { %v697_v44 = vadd.f32 %v1008_v43, %v1336_v41  ;;  %v691_v45 = vpop.f32.mrb[29].mxu1 }
 0x1fd   :  { %v692_v1 = vadd.f32 %v1336_v41, %v691_v45 }
 0x1fe   :  { %734 = vst.msk [vmem:[%s1513_s5 + $0x108] sm:$0xff] %vm700_vm2, %v697_v44 }
 0x1ff   :  { %733 = vst.msk [vmem:[%s1513_s5 + $0x100] sm:$0xff] %vm700_vm2, %v692_v1 }

</bundles_post_ra>
